<compile_context>
chip_gen: v7x
topology: tpu7x:2x2x1
jax: 0.10.0
libtpu: 0.0.40
codegen_flags: <defaults>
</compile_context>

<pallas_src>
import functools

import jax
import jax.numpy as jnp
from jax import lax
from jax.experimental import pallas as pl
from jax.experimental.pallas import tpu as pltpu


def _round_up(x: int, m: int) -> int:
    return ((x + m - 1) // m) * m


def _nce_logsumexp_kernel(fx_ref, fy_ref, rowsum_ref, colsum_ref, *,
                          inv_t, n_x, n_y, need_mask):
    """One (row-tile i, col-tile j) step.

    fx_ref:      (tm, Dp) bf16, already L2-normalized and scaled by 1/nce_t.
    fy_ref:      (tn, Dp) bf16, already L2-normalized.
    rowsum_ref:  (tm, 1)  f32 output block, resident across the j sweep
                 (accumulates sum_j exp(logits - inv_t) per row).
    colsum_ref:  (1, 1, tn) f32 output block, one independent partial per (i, j)
                 (sum over this row tile of exp(logits - inv_t) per column).
    """
    i = pl.program_id(0)
    j = pl.program_id(1)
    tm = fx_ref.shape[0]
    tn = fy_ref.shape[0]

    # New row tile -> reset the resident row exp-sum accumulator.
    @pl.when(j == 0)
    def _():
        rowsum_ref[...] = jnp.zeros_like(rowsum_ref)

    # bf16 x bf16 -> f32 logits tile on the MXU (already scaled by 1/nce_t).
    logits = lax.dot_general(fx_ref[...], fy_ref[...],
                             (((1,), (1,)), ((), ())),
                             preferred_element_type=jnp.float32)      # (tm, tn)

    # Fixed-shift logsumexp: |logits| <= 1/nce_t for L2-normalized features.
    e = jnp.exp(logits - inv_t)                                       # (tm, tn)

    if need_mask:
        # Only needed when Nx/Ny are not tile multiples; cheap VPU filler.
        row_ok = (i * tm + lax.broadcasted_iota(jnp.int32, (tm, 1), 0)) < n_x
        col_ok = (j * tn + lax.broadcasted_iota(jnp.int32, (1, tn), 1)) < n_y
        e = jnp.where(jnp.logical_and(row_ok, col_ok), e, 0.0)

    rowsum_ref[...] += jnp.sum(e, axis=1, keepdims=True)              # (tm, 1)
    colsum_ref[0] = jnp.sum(e, axis=0, keepdims=True)                 # (1, tn)


def nce_softmax_loss(feat_x, feat_y, corr_x, corr_y, nce_t,
                     *, tile_m=1024, tile_n=1024):
    """feat_x: (1, Nx, D) or (Nx, D); feat_y: (1, Ny, D) or (Ny, D);
    corr_x/corr_y: (P,) int indices.  Returns the scalar NCE softmax loss."""
    fx = jnp.asarray(feat_x, jnp.float32)
    fy = jnp.asarray(feat_y, jnp.float32)
    if fx.ndim == 3:
        fx = fx[0]
    if fy.ndim == 3:
        fy = fy[0]
    Nx, D = fx.shape
    Ny, _ = fy.shape
    corr_x = jnp.asarray(corr_x, jnp.int32)
    corr_y = jnp.asarray(corr_y, jnp.int32)
    P = corr_x.shape[0]
    del P  # mean() handles it

    inv_t = 1.0 / float(nce_t)
    if 2.0 * inv_t > 80.0:
        # TODO(synk): add an online-max logsumexp fallback for very small nce_t;
        # the fixed shift only needs exp(-2/nce_t) to stay a healthy normal f32.
        raise ValueError("nce_t too small for the fixed-shift logsumexp path")

    # --- one-time normalization / scaling / cast / pad (fused XLA pass) -------
    fx_n = fx / jnp.maximum(jnp.linalg.norm(fx, axis=-1, keepdims=True), 1e-12)
    fy_n = fy / jnp.maximum(jnp.linalg.norm(fy, axis=-1, keepdims=True), 1e-12)

    # --- tile-size sanitization (layout constraints + VMEM budget) ------------
    # tm: multiple of 16 (bf16 sublane packing).  tn: multiple of 128 when
    # multi-tiled so the column-partial output stays lane-aligned; otherwise a
    # single full-width column tile.
    if Nx <= tile_m:
        tm = _round_up(Nx, 16)
    else:
        tm = max(16, (int(tile_m) // 16) * 16)
    if Ny <= tile_n:
        tn = _round_up(Ny, 16)
    else:
        tn = max(128, (int(tile_n) // 128) * 128)
    Nxp = _round_up(Nx, tm)
    Nyp = _round_up(Ny, tn)
    Dp = _round_up(D, 128)
    n_i = Nxp // tm
    n_j = Nyp // tn
    need_mask = (Nxp != Nx) or (Nyp != Ny)

    fx_in = jnp.pad((fx_n * inv_t).astype(jnp.bfloat16),
                    ((0, Nxp - Nx), (0, Dp - D)))
    fy_in = jnp.pad(fy_n.astype(jnp.bfloat16), ((0, Nyp - Ny), (0, Dp - D)))

    kernel = functools.partial(_nce_logsumexp_kernel, inv_t=inv_t,
                               n_x=Nx, n_y=Ny, need_mask=need_mask)

    grid_spec = pltpu.PrefetchScalarGridSpec(
        num_scalar_prefetch=0,
        grid=(n_i, n_j),
        in_specs=[
            pl.BlockSpec((tm, Dp), lambda i, j: (i, 0)),    # feat_x row tile
            pl.BlockSpec((tn, Dp), lambda i, j: (j, 0)),    # feat_y column tile
        ],
        out_specs=[
            # Row exp-sums: resident across the column sweep (reduction axis j).
            pl.BlockSpec((tm, 1), lambda i, j: (i, 0)),
            # Column exp-sum partials: one independent lane-dense block per (i, j).
            pl.BlockSpec((1, 1, tn), lambda i, j: (i, 0, j)),
        ],
    )

    rowsum, colpart = pl.pallas_call(
        kernel,
        out_shape=(jax.ShapeDtypeStruct((Nxp, 1), jnp.float32),
                   jax.ShapeDtypeStruct((n_i, 1, Nyp), jnp.float32)),
        grid_spec=grid_spec,
        compiler_params=pltpu.CompilerParams(
            # Row axis parallel (megacore on v7x); only the column axis carries
            # cross-iteration state (the resident row exp-sum block).
            dimension_semantics=("parallel", "arbitrary"),
            vmem_limit_bytes=32 * 1024 * 1024),
    )(fx_in, fy_in)

    # --- tiny XLA epilogue: O(Nx + Ny + P*D) ----------------------------------
    row_sums = rowsum[:Nx, 0]                                  # (Nx,)
    col_sums = jnp.sum(colpart[:, 0, :], axis=0)[:Ny]          # (Ny,)
    lse_rows = inv_t + jnp.log(row_sums)                       # logsumexp over cols
    lse_cols = inv_t + jnp.log(col_sums)                       # logsumexp over rows
    pos = jnp.sum(fx_n[corr_x] * fy_n[corr_y], axis=-1) * inv_t  # logits[cx_p, cy_p]
    loss_x = jnp.mean(lse_rows[corr_x] - pos)
    loss_y = jnp.mean(lse_cols[corr_y] - pos)
    return loss_x + loss_y


def _reference(feat_x, feat_y, corr_x, corr_y, nce_t):
    fx = feat_x[0]
    fy = feat_y[0]
    fx = fx / jnp.maximum(jnp.linalg.norm(fx, axis=-1, keepdims=True), 1e-12)
    fy = fy / jnp.maximum(jnp.linalg.norm(fy, axis=-1, keepdims=True), 1e-12)
    logits = jnp.matmul(fx, fy.T, precision=jax.lax.Precision.HIGHEST) / nce_t
    lx = logits[corr_x]          # (P, Ny)
    ly = logits.T[corr_y]        # (P, Nx)

    def ce(lg, tgt):
        lse = jax.scipy.special.logsumexp(lg, axis=-1)
        picked = lg[jnp.arange(lg.shape[0]), tgt]
        return jnp.mean(lse - picked)

    return ce(lx, corr_y) + ce(ly, corr_x)


if __name__ == "__main__":
    key = jax.random.PRNGKey(0)
    k1, k2, k3, k4 = jax.random.split(key, 4)

    Nx, Ny, D, P = 200, 176, 32, 12
    nce_t = 0.07  # deterministic module hyper-parameter (no learned weights)

    feat_x = jax.random.normal(k1, (1, Nx, D), dtype=jnp.float32)
    feat_y = jax.random.normal(k2, (1, Ny, D), dtype=jnp.float32)
    corr_x = jax.random.randint(k3, (P,), 0, Nx, dtype=jnp.int32)
    corr_y = jax.random.randint(k4, (P,), 0, Ny, dtype=jnp.int32)

    ref = _reference(feat_x, feat_y, corr_x, corr_y, nce_t)

    # Multi-tile grid (128x128 tiles -> 2x2 grid with row & column padding):
    # exercises the online row accumulator, the per-(i, j) column partials, and
    # the padding masks.
    loss_tiled = jax.block_until_ready(
        nce_softmax_loss(feat_x, feat_y, corr_x, corr_y, nce_t,
                         tile_m=128, tile_n=128))
    # Single-tile grid with the default (production) tile sizes.
    loss_single = jax.block_until_ready(
        nce_softmax_loss(feat_x, feat_y, corr_x, corr_y, nce_t))

    # Tolerance covers bf16 MXU operands (f32 accumulation).
    assert jnp.allclose(loss_tiled, ref, rtol=2e-2, atol=2e-2), (loss_tiled, ref)
    assert jnp.allclose(loss_single, ref, rtol=2e-2, atol=2e-2), (loss_single, ref)
    assert jnp.allclose(loss_tiled, loss_single, rtol=1e-2, atol=1e-2), (
        loss_tiled, loss_single)

    print("KERNEL_OK")
</pallas_src>

<mosaic_0001>
module attributes {stable_mosaic.version = 11 : i64} {
  func.func @_nce_logsumexp_kernel(%arg0: i32, %arg1: i32, %arg2: memref<128x128xbf16, #tpu.memory_space<vmem>>, %arg3: memref<128x128xbf16, #tpu.memory_space<vmem>>, %arg4: memref<128x1xf32, #tpu.memory_space<vmem>>, %arg5: memref<1x1x128xf32, #tpu.memory_space<vmem>>) attributes {dimension_semantics = [#tpu.dimension_semantics<parallel>, #tpu.dimension_semantics<arbitrary>], iteration_bounds = array<i64: 2, 2>, scalar_prefetch = 0 : i64, scratch_operands = 0 : i64, tpu.core_type = #tpu.core_type<tc>, window_params = [{transform_indices = @transform_0, window_bounds = array<i64: 128, 128>}, {transform_indices = @transform_1, window_bounds = array<i64: 128, 128>}, {transform_indices = @transform_2, window_bounds = array<i64: 128, 1>}, {transform_indices = @transform_3, window_bounds = array<i64: 1, 1, 128>}]} {
    %c0_i32 = arith.constant 0 : i32
    %0 = arith.cmpi eq, %arg1, %c0_i32 : i32
    %1 = arith.extui %0 : i1 to i32
    %c0_i32_0 = arith.constant 0 : i32
    %2 = arith.cmpi ne, %1, %c0_i32_0 : i32
    scf.if %2 {
      %cst_16 = arith.constant 0.000000e+00 : f32
      %36 = vector.broadcast %cst_16 : f32 to vector<128x1xf32>
      %c0_17 = arith.constant 0 : index
      %c0_18 = arith.constant 0 : index
      %37 = vector.load %arg4[%c0_17, %c0_18] : memref<128x1xf32, #tpu.memory_space<vmem>>, vector<128x1xf32>
      tpu.vector_store %arg4[%c0_17, %c0_18], %36 {strides = array<i32>} : memref<128x1xf32, #tpu.memory_space<vmem>>, vector<128x1xf32>,
    } else {
    }
    %c0 = arith.constant 0 : index
    %c0_1 = arith.constant 0 : index
    %3 = vector.load %arg2[%c0, %c0_1] : memref<128x128xbf16, #tpu.memory_space<vmem>>, vector<128x128xbf16>
    %c0_2 = arith.constant 0 : index
    %c0_3 = arith.constant 0 : index
    %4 = vector.load %arg3[%c0_2, %c0_3] : memref<128x128xbf16, #tpu.memory_space<vmem>>, vector<128x128xbf16>
    %cst = arith.constant dense<0.000000e+00> : vector<128x128xf32>
    %5 = tpu.matmul %3, %4, %cst {dimension_numbers = #tpu.dot_dimension_numbers<[1], [1], [0], [0], [0, 0, 1, 0], [], []>} : vector<128x128xbf16>, vector<128x128xbf16>, vector<128x128xf32> -> vector<128x128xf32>
    %cst_4 = arith.constant 14.2857141 : f32
    %6 = vector.broadcast %cst_4 : f32 to vector<128x128xf32>
    %7 = arith.subf %5, %6 : vector<128x128xf32>
    %8 = math.exp %7 : vector<128x128xf32>
    %c128_i32 = arith.constant 128 : i32
    %9 = arith.muli %arg0, %c128_i32 : i32
    %10 = tpu.iota {dimensions = array<i32: 0>} : vector<128x1xi32>
    %11 = vector.broadcast %9 : i32 to vector<128x1xi32>
    %12 = arith.addi %11, %10 : vector<128x1xi32>
    %c200_i32 = arith.constant 200 : i32
    %13 = vector.broadcast %c200_i32 : i32 to vector<128x1xi32>
    %14 = arith.cmpi slt, %12, %13 : vector<128x1xi32>
    %c128_i32_5 = arith.constant 128 : i32
    %15 = arith.muli %arg1, %c128_i32_5 : i32
    %16 = tpu.iota {dimensions = array<i32: 1>} : vector<1x128xi32>
    %17 = vector.broadcast %15 : i32 to vector<1x128xi32>
    %18 = arith.addi %17, %16 : vector<1x128xi32>
    %c176_i32 = arith.constant 176 : i32
    %19 = vector.broadcast %c176_i32 : i32 to vector<1x128xi32>
    %20 = arith.cmpi slt, %18, %19 : vector<1x128xi32>
    %21 = vector.broadcast %14 : vector<128x1xi1> to vector<128x128xi1>
    %22 = vector.broadcast %20 : vector<1x128xi1> to vector<128x128xi1>
    %23 = arith.andi %21, %22 : vector<128x128xi1>
    %cst_6 = arith.constant 0.000000e+00 : f32
    %24 = vector.broadcast %cst_6 : f32 to vector<128x128xf32>
    %25 = arith.select %23, %8, %24 : vector<128x128xi1>, vector<128x128xf32>
    %c0_7 = arith.constant 0 : index
    %c0_8 = arith.constant 0 : index
    %26 = vector.load %arg4[%c0_7, %c0_8] : memref<128x1xf32, #tpu.memory_space<vmem>>, vector<128x1xf32>
    %cst_9 = arith.constant dense<0.000000e+00> : vector<128xf32>
    %27 = vector.multi_reduction <add>, %25, %cst_9 [1] : vector<128x128xf32> to vector<128xf32>
    %28 = vector.shape_cast %27 : vector<128xf32> to vector<128x1xf32>
    %29 = arith.addf %26, %28 : vector<128x1xf32>
    %c0_10 = arith.constant 0 : index
    %c0_11 = arith.constant 0 : index
    %30 = vector.load %arg4[%c0_10, %c0_11] : memref<128x1xf32, #tpu.memory_space<vmem>>, vector<128x1xf32>
    tpu.vector_store %arg4[%c0_10, %c0_11], %29 {strides = array<i32>} : memref<128x1xf32, #tpu.memory_space<vmem>>, vector<128x1xf32>,
    %cst_12 = arith.constant dense<0.000000e+00> : vector<128xf32>
    %31 = vector.multi_reduction <add>, %25, %cst_12 [0] : vector<128x128xf32> to vector<128xf32>
    %32 = vector.shape_cast %31 : vector<128xf32> to vector<1x128xf32>
    %c0_13 = arith.constant 0 : index
    %c0_14 = arith.constant 0 : index
    %c0_15 = arith.constant 0 : index
    %33 = vector.load %arg5[%c0_13, %c0_14, %c0_15] : memref<1x1x128xf32, #tpu.memory_space<vmem>>, vector<1x1x128xf32>
    %34 = vector.shape_cast %33 : vector<1x1x128xf32> to vector<1x128xf32>
    %35 = vector.shape_cast %32 : vector<1x128xf32> to vector<1x1x128xf32>
    tpu.vector_store %arg5[%c0_13, %c0_14, %c0_15], %35 {strides = array<i32>} : memref<1x1x128xf32, #tpu.memory_space<vmem>>, vector<1x1x128xf32>,
    return
  }
  func.func @transform_0(%arg0: i32, %arg1: i32) -> (i32, i32) {
    %c0_i32 = arith.constant 0 : i32
    %c0_i32_0 = arith.constant 0 : i32
    return %arg0, %c0_i32 : i32, i32
  }
  func.func @transform_1(%arg0: i32, %arg1: i32) -> (i32, i32) {
    %c0_i32 = arith.constant 0 : i32
    %c0_i32_0 = arith.constant 0 : i32
    return %arg1, %c0_i32 : i32, i32
  }
  func.func @transform_2(%arg0: i32, %arg1: i32) -> (i32, i32) {
    %c0_i32 = arith.constant 0 : i32
    %c0_i32_0 = arith.constant 0 : i32
    return %arg0, %c0_i32 : i32, i32
  }
  func.func @transform_3(%arg0: i32, %arg1: i32) -> (i32, i32, i32) {
    %c0_i32 = arith.constant 0 : i32
    %c0_i32_0 = arith.constant 0 : i32
    return %arg0, %c0_i32, %arg1 : i32, i32, i32
  }
}

</mosaic_0001>

<bundles_post_ra>
// kernel: tpu_custom_call.1
= control target key start
LH: loop header
LB: loop body
LE: loop exit
PB: predicated region body
PF: predicated region fallthrough
CT: control target
= control target key end

     0   :  { %s2036_s0 = inlined_call_operand.hbm [shape: bf16[256,128], index: 0, kind: input, shape index: {}]   ;;  %s2037_s1 = inlined_call_operand.hbm [shape: bf16[256,128], index: 1, kind: input, shape index: {}]   ;;  %s2038_s2 = inlined_call_operand.vmem [shape: f32[256,1], index: 2, kind: output, shape index: {0}]   ;;  %s2039_s3 = inlined_call_operand.hbm [shape: f32[2,1,256], index: 3, kind: output, shape index: {1}]  }
   0x1   :  { %2052 = sst [smem:[#allocation15_spill]] %s2036_s0 }
   0x2   :  { %2053 = sst [smem:[#allocation16_spill]] %s2039_s3 }
   0x3   :  { %9 = vsyncpa [#allocation3], 0 }
   0x4   :  { %11 = vsyncpa [#allocation3 + $0x1], 0 }
   0x5   :  { %12 = vsyncpa [#allocation6], 0 }
   0x6   :  { %14 = vsyncpa [#allocation6 + $0x1], 0 }
   0x7   :  { %15 = vsyncpa [#allocation4], 0 }
   0x8   :  { %17 = vsyncpa [#allocation4 + $0x1], 0  ;;  %s1470_s12 = smov 0   ;;  %s1472_s13 = smov 0  }
   0x9   :  { %s1474_s14 = smov 0   ;;  %s1476_s15 = smov 0  }
   0xa   :  { %s1478_s16 = smov 0   ;;  %s1480_s17 = smov 0  }
   0xb   :  { %s1482_s18 = smov 0   ;;  %s1484_s19 = smov 0  }
   0xc   :  { %s1486_s20 = smov 0   ;;  %s1488_s21 = smov 0  }
   0xd   :  { %s1490_s22 = smov 0   ;;  %s1492_s23 = smov 0  }
   0xe   :  { %s1494_s24 = smov 0   ;;  %s1496_s25 = smov 0  }
   0xf LB: > { %2054 = sst [smem:[#allocation11_spill]] %s1434_s23  ;;  %s930_s26 = sadd.s32 4294967295, %s1442_s25   ;;  %s1442_s25 = sphi %s1496_s25, %s23_s25   ;;  %s1438_s24 = sphi %s1494_s24, %s2087_s24   ;;  %s1434_s23 = sphi %s1492_s23, %s2086_s23   ;;  %s1430_s22 = sphi %s1490_s22, %s2085_s22   ;;  %s1426_s21 = sphi %s1488_s21, %s2084_s21   ;;  %s1422_s20 = sphi %s1486_s20, %s2096_s20   ;;  %s1418_s19 = sphi %s1484_s19, %s2095_s19   ;;  %s1414_s18 = sphi %s1482_s18, %s2094_s18   ;;  %s1410_s17 = sphi %s1480_s17, %s2093_s17   ;;  %s1406_s16 = sphi %s1478_s16, %s2092_s16   ;;  %s1402_s15 = sphi %s1476_s15, %s2091_s15   ;;  %s1398_s14 = sphi %s1474_s14, %s2090_s14   ;;  %s1394_s13 = sphi %s1472_s13, %s2089_s13   ;;  %s1390_s12 = sphi %s1470_s12, %s2088_s12  }
  0x10   : > { %2055 = sst [smem:[#allocation12_spill]] %s1438_s24  ;;  %p49_p0 = scmp.ne.s32.totalorder %s1422_s20, %s1418_s19 }
  0x11   : > { %p2041_p1 = scmp.eq.s32.totalorder %s1442_s25, 0  ;;  %p55_p2 = scmp.ne.s32.totalorder %s1418_s19, %s1414_s18 }
  0x12   : > { %p1547_p3 = scmp.eq.s32.totalorder %s930_s26, 0  ;;  %p2040_p6 = scmp.lt.s32.totalorder %s1442_s25, 4 }
  0x13   : > { %p51_p4 = por %p2041_p1, %p49_p0  ;;  %s159_s4 = sand.u32 1, %s1422_s20  }
  0x14   : > { %p1555_p5 = por %p1547_p3, %p55_p2  ;;  %s984_s5 = sshll.u32 %s1438_s24, 10 }
  0x15   : > { %s934_s6 = sshll.u32 %s159_s4, 6  ;;  %s2058_s0 = sld [smem:[#allocation15_spill]] }
  0x16   : > { %s2057_s30 = scalar_select %p1555_p5, 1, 0 }
  0x17   : > { %s163_s10 = scalar_lea.vmem [#allocation2], %s934_s6  ;;  %p1569_p7 = pnand %p2040_p6, %p51_p4 }
  0x18   : > { %s170_s11 = sshll.u32 %s163_s10, 4  ;;  %s1575_s28 = scalar_lea.sflag [#allocation3], %s159_s4  ;;  %s1573_s11 = int_to_ptr.vmem [resolvable:$true] %s170_s11 }
  0x19   : > { %p1234_p9 = pneg %p1569_p7 }
  0x1b   : > { %s1565_s9 = scalar_lea.hbm %s2058_s0, %s984_s5  ;;  %s1237_s8 = scalar_lea.hbm %s2058_s0, 2048 }
  0x1c   : > { %s1232_s7 = scalar_lea.hbm %s1565_s9, 1024  ;;  %p1238_p12 = scmp.lt.u32.totalorder %s1565_s9, %s2058_s0 }
  0x1d   : > { %p1233_p8 = scmp.ne.s32.totalorder %s1565_s9, %s1232_s7  ;;  %p1239_p13 = scmp.lt.u32.totalorder %s1237_s8, %s1232_s7 }
  0x1e   : > { %p1241_p2 = scmp.lt.u32.totalorder %s1232_s7, %s1565_s9 }
  0x1f   : > { %p1235_p10 = pnand %p1234_p9, %p1233_p8  ;;  %p1240_p0 = por %p1239_p13, %p1238_p12 }
  0x21   : > { %p1236_p11 = pneg %p1235_p10  ;;  %p1242_p4 = por %p1241_p2, %p1240_p0 }
  0x23   : > { %p1243_p6 = pnand %p1242_p4, %p1236_p11 }
  0x25   : > { %1246 = shalt.err (!%p1243_p6)
}
  0x26   : > { %s1247_s4 = scalar_lea.vmem %s1573_s11, 1024  ;;  %s1444_s5 = smov [#allocation2]  }
  0x27   : > { %p1248_p8 = scmp.ne.s32.totalorder %s1573_s11, %s1247_s4  ;;  %s1252_s6 = sshll.u32 %s1444_s5, 4  ;;  %s1253_s6 = int_to_ptr.vmem [resolvable:$false] %s1252_s6 }
  0x28   : > { %s1254_s27 = scalar_lea.vmem %s1253_s6, 2048  ;;  %p1255_p5 = scmp.lt.s32.totalorder %s1573_s11, %s1253_s6 }
  0x29   : > { %p1250_p10 = pnand %p1248_p8, %p1234_p9  ;;  %p1256_p12 = scmp.lt.s32.totalorder %s1254_s27, %s1247_s4 }
  0x2b   : > { %p1251_p1 = pneg %p1250_p10  ;;  %p1257_p13 = por %p1256_p12, %p1255_p5 }
  0x2d   : > { %p1258_p0 = pnand %p1257_p13, %p1251_p1 }
  0x2f   : > { %1261 = shalt.err (!%p1258_p0)
}
  0x30   : > { %s2043_s7 = smov 64   ;;  %s2044_s8 = smov 4  }
  0x31   : > { %1059 = dma.hbm_to_vmem [thread:$0]  (!%p1569_p7), %s1565_s9, 1024, %s1573_s11, %s1575_s28, %s2043_s7, %s2043_s7, %s2044_s8  }
  0x32   : > { %p940_p1 = scmp.ge.s32.totalorder %s1442_s25, 1  ;;  %p199_p5 = scmp.lt.s32.totalorder %s1442_s25, 5 }
  0x33   : > { %p1610_p6 = scmp.eq.s32.totalorder %s930_s26, 3  ;;  %s931_s18 = sadd.s32 4294967294, %s1442_s25  }
  0x34   : > { %p1614_p9 = pnand %p940_p1, %p199_p5  ;;  %s32_s5 = sadd.s32 1, %s1434_s23 }
  0x35   : > { %p33_p7 = scmp.ge.s32.totalorder %s32_s5, 2  ;;  %s68_s28 = sadd.s32 1, %s1410_s17 }
  0x36   : > { %p75_p11 = scmp.ne.s32.totalorder %s1410_s17, %s1406_s16  ;;  %p81_p2 = scmp.ne.s32.totalorder %s1406_s16, %s1402_s15 }
  0x37   : > { %s2098_s5 = smov (%p33_p7, %s32_s5), 0  ;;  %s2063_s26 = sadd.s32 1, %s1438_s24 }
  0x38   : > { %2062 = sst [smem:[#allocation13_spill]] %s2098_s5  ;;  %s2100_s26 = smov (!%p33_p7, %s2063_s26), %s1438_s24 }
  0x39   : > { %s65_s9 = ssub.s32 %s1434_s23, %s2098_s5  ;;  %s122_s11 = sadd.s32 1, %s1398_s14 }
  0x3a   : > { %p37_p4 = scmp.ge.s32.totalorder %s2100_s26, 2  ;;  %p66_p8 = scmp.eq.s32.totalorder %s65_s9, 0 }
  0x3b   : > { %p1635_p10 = por %p81_p2, %p1547_p3  ;;  %p132_p12 = scmp.ne.s32.totalorder %s1398_s14, %s1394_s13 }
  0x3c   : > { %s2102_s26 = smov (%p37_p4, %s2100_s26), 0  ;;  %p138_p1 = scmp.ne.s32.totalorder %s1394_s13, %s1390_s12 }
  0x3d   : > { %s2064_s15 = scalar_select %p1635_p10, 1, 0 }
  0x3e   : > { %2065 = sst [smem:[#allocation14_spill]] %s2102_s26  ;;  %s39_s27 = ssub.s32 %s1438_s24, %s2102_s26 }
  0x3f   : > { %s1644_s6 = scalar_select %p66_p8, %s1410_s17, %s68_s28  }
  0x40   : > { %p1650_p13 = por %p1610_p6, %p132_p12  ;;  %p40_p0 = scmp.eq.s32.totalorder %s39_s27, 0 }
  0x41   : > { %s119_s29 = sor.u32 %s65_s9, %s39_s27  ;;  %s2067_s8 = sadd.s32 1, %s1422_s20 }
  0x42   : > { %s2066_s7 = scalar_select %p1650_p13, 1, 0 }
  0x43   : > { %p120_p3 = scmp.eq.s32.totalorder %s119_s29, 0  ;;  %p139_p5 = scmp.eq.s32.totalorder %s931_s18, 3 }
  0x44   : > { %s1659_s0 = scalar_select %p40_p0, %s1422_s20, %s2067_s8  }
  0x45   : > { %s1662_s5 = scalar_select %p120_p3, %s1398_s14, %s122_s11  }
  0x46   : > { %s180_s3 = sand.u32 1, %s1410_s17   ;;  %p2068_p7 = scmp.eq.s32.totalorder %s1442_s25, 0 }
  0x47   : > { %s937_s10 = sshll.u32 %s180_s3, 6  ;;  %p1670_p6 = por %p139_p5, %p138_p1 }
  0x48   : > { %p77_p2 = por %p75_p11, %p2068_p7  ;;  %s985_s26 = sshll.u32 %s1434_s23, 10 }
  0x49   : > { %s2069_s28 = scalar_select %p1670_p6, 1, 0 }
  0x4a   : > { %s184_s24 = scalar_lea.vmem [#allocation5], %s937_s10  ;;  %s1678_s8 = scalar_lea.hbm %s2037_s1, %s985_s26 }
  0x4b   : > { %s191_s9 = sshll.u32 %s184_s24, 4  ;;  %p2070_p11 = scmp.lt.s32.totalorder %s1442_s25, 4  ;;  %s1680_s9 = int_to_ptr.vmem [resolvable:$true] %s191_s9 }
  0x4c   : > { %s1688_s11 = scalar_lea.sflag [#allocation6], %s180_s3  ;;  %s1262_s24 = scalar_lea.hbm %s1678_s8, 1024 }
  0x4d   : > { %p1684_p4 = pnand %p2070_p11, %p77_p2  ;;  %p1263_p8 = scmp.ne.s32.totalorder %s1678_s8, %s1262_s24 }
  0x4e   : > { %s1267_s27 = scalar_lea.hbm %s2037_s1, 2048  ;;  %p1268_p1 = scmp.lt.u32.totalorder %s1678_s8, %s2037_s1 }
  0x4f   : > { %p1264_p12 = pneg %p1684_p4  ;;  %p1269_p5 = scmp.lt.u32.totalorder %s1267_s27, %s1262_s24 }
  0x50   : > { %p1271_p2 = scmp.lt.u32.totalorder %s1262_s24, %s1678_s8 }
  0x51   : > { %p1265_p0 = pnand %p1264_p12, %p1263_p8  ;;  %p1270_p7 = por %p1269_p5, %p1268_p1 }
  0x53   : > { %p1266_p3 = pneg %p1265_p0  ;;  %p1272_p11 = por %p1271_p2, %p1270_p7 }
  0x55   : > { %p1273_p6 = pnand %p1272_p11, %p1266_p3 }
  0x57   : > { %1276 = shalt.err (!%p1273_p6)
}
  0x58   : > { %s1277_s3 = scalar_lea.vmem %s1680_s9, 1024  ;;  %s1447_s26 = smov [#allocation5]  }
  0x59   : > { %p1278_p8 = scmp.ne.s32.totalorder %s1680_s9, %s1277_s3  ;;  %s1282_s10 = sshll.u32 %s1447_s26, 4  ;;  %s1283_s10 = int_to_ptr.vmem [resolvable:$false] %s1282_s10 }
  0x5a   : > { %s1284_s23 = scalar_lea.vmem %s1283_s10, 2048  ;;  %p1285_p10 = scmp.lt.s32.totalorder %s1680_s9, %s1283_s10 }
  0x5b   : > { %p1280_p0 = pnand %p1278_p8, %p1264_p12  ;;  %p1286_p1 = scmp.lt.s32.totalorder %s1284_s23, %s1277_s3 }
  0x5d   : > { %p1281_p13 = pneg %p1280_p0  ;;  %p1287_p5 = por %p1286_p1, %p1285_p10 }
  0x5f   : > { %p1288_p7 = pnand %p1287_p5, %p1281_p13 }
  0x61   : > { %1291 = shalt.err (!%p1288_p7)
}
  0x62   : > { %s2072_s24 = smov 4   ;;  %s2073_s27 = smov 64  }
  0x63   : > { %1062 = dma.hbm_to_vmem [thread:$0]  (!%p1684_p4), %s1678_s8, 1024, %s1680_s9, %s1688_s11, %s2073_s27, %s2073_s27, %s2072_s24  }
  0x64   : > { %203 = sbr.rel (%p1614_p9) target bundleno = 593 (0x251), region = 28  ;;  %s205_s29 = sand.u32 (!%p1614_p9), 1, %s1418_s19  }
  0x65   : > { %s941_s26 = sshll.u32 (!%p1614_p9), %s205_s29, 6  ;;  %s206_s3 = scalar_lea.sflag (!%p1614_p9), [#allocation3], %s205_s29 }
  0x66   : > { %s1722_s10 = scalar_lea.vmem (!%p1614_p9), [#allocation2], %s941_s26  ;;  %p2074_p10 = scmp.ne.s32.totalorder (!%p1614_p9), %s2057_s30, 0 }
  0x6b   : > { %1377 = dma.done.wait (%p2074_p10), %s206_s3, 1024  }
  0x6c   : > { %1379 = vsyncadd (%p2074_p10), %s206_s3, 4294966272  ;;  %s214_s18 = sand.u32 1, %s1406_s16   ;;  %p2075_p9 = scmp.ne.s32.totalorder %s2064_s15, 0 }
  0x6d   : > { %s942_s23 = sshll.u32 %s214_s18, 6  ;;  %s215_s9 = scalar_lea.sflag [#allocation6], %s214_s18 }
  0x6e   : > { %s1729_s8 = scalar_lea.vmem [#allocation5], %s942_s23 }
  0x6f   : > { %1381 = dma.done.wait (%p2075_p9), %s215_s9, 1024  }
  0x70   : > { %1383 = vsyncadd (%p2075_p9), %s215_s9, 4294966272  ;;  %s248_s4 = sand.u32 1, %s1394_s13   ;;  %s943_s11 = sshll.u32 %s1430_s22, 4 }
  0x71   : > { %p253_p13 = scmp.lt.s32.totalorder %s943_s11, 31  ;;  %s1744_s26 = scalar_lea.vmem [#allocation7], %s248_s4 }
  0x72   : > { %p945_p6 = scmp.ne.s32.totalorder %s1426_s21, 0 }
  0x73   : > { %s2104_s11 = smov (!%p253_p13, %s943_s11), 31  ;;  %vm263_vm0 = vcmask (!%p945_p6), 7168   ;;  %v1448_v0 = vmov (!%p945_p6), 0.0  }
  0x74   : > { %s944_s30 = sshll.u32 %s2104_s11, 3  ;;  %262 = sbr.rel (%p945_p6) target bundleno = 126 (0x7e), region = 40 }
  0x75   : > { %s1740_s29 = scalar_lea.vmem %s2038_s2, %s944_s30 }
  0x76   : > { %264 = vst.msk [vmem:[%s1740_s29] sm:$0xff] (!%p945_p6), %vm263_vm0, %v1448_v0  ;;  %265 = vst.msk [vmem:[%s1740_s29 + $0x8] sm:$0xff] (!%p945_p6), %vm263_vm0, %v1448_v0 }
  0x77   : > { %266 = vst.msk [vmem:[%s1740_s29 + $0x10] sm:$0xff] (!%p945_p6), %vm263_vm0, %v1448_v0  ;;  %267 = vst.msk [vmem:[%s1740_s29 + $0x18] sm:$0xff] (!%p945_p6), %vm263_vm0, %v1448_v0 }
  0x78   : > { %268 = vst.msk [vmem:[%s1740_s29 + $0x20] sm:$0xff] (!%p945_p6), %vm263_vm0, %v1448_v0  ;;  %269 = vst.msk [vmem:[%s1740_s29 + $0x28] sm:$0xff] (!%p945_p6), %vm263_vm0, %v1448_v0 }
  0x79   : > { %270 = vst.msk [vmem:[%s1740_s29 + $0x30] sm:$0xff] (!%p945_p6), %vm263_vm0, %v1448_v0  ;;  %271 = vst.msk [vmem:[%s1740_s29 + $0x38] sm:$0xff] (!%p945_p6), %vm263_vm0, %v1448_v0 }
  0x7a   : > { %272 = vst.msk [vmem:[%s1740_s29 + $0x40] sm:$0xff] (!%p945_p6), %vm263_vm0, %v1448_v0  ;;  %273 = vst.msk [vmem:[%s1740_s29 + $0x48] sm:$0xff] (!%p945_p6), %vm263_vm0, %v1448_v0 }
  0x7b   : > { %274 = vst.msk [vmem:[%s1740_s29 + $0x50] sm:$0xff] %vm263_vm0, %v1448_v0  ;;  %275 = vst.msk [vmem:[%s1740_s29 + $0x58] sm:$0xff] %vm263_vm0, %v1448_v0 }
  0x7c   : > { %276 = vst.msk [vmem:[%s1740_s29 + $0x60] sm:$0xff] %vm263_vm0, %v1448_v0  ;;  %277 = vst.msk [vmem:[%s1740_s29 + $0x68] sm:$0xff] %vm263_vm0, %v1448_v0 }
  0x7d   : > { %278 = vst.msk [vmem:[%s1740_s29 + $0x70] sm:$0xff] %vm263_vm0, %v1448_v0  ;;  %279 = vst.msk [vmem:[%s1740_s29 + $0x78] sm:$0xff] %vm263_vm0, %v1448_v0 }
  0x7e PF: > { %v1184_v1 = vld [vmem:[%s1729_s8] sm:$0xff]   ;;  %v1185_v2 = vld [vmem:[%s1729_s8 + $0x8] sm:$0xff]   ;;  %v1186_v3 = vld [vmem:[%s1729_s8 + $0x10] sm:$0xff]   ;;  %v554_v17 = vlaneseq  ;;  %s978_s15 = sshll.u32 %s1430_s22, 7  ;;  %s979_s3 = sshll.u32 %s1426_s21, 7 }
  0x7f   : > { %1002 = vmatprep.subr.bf16.mxu0 %v1184_v1  ;;  %1034 = vmatprep.subr.bf16.mxu1 %v1184_v1  ;;  %v1192_v4 = vld [vmem:[%s1722_s10] sm:$0xff]   ;;  %v1187_v6 = vld [vmem:[%s1729_s8 + $0x18] sm:$0xff]   ;;  %v1189_v8 = vld [vmem:[%s1729_s8 + $0x28] sm:$0xff]   ;;  %v1801_v28 = vstv %s978_s15  ;;  %s803_s9 = sshll.u32 %s1744_s26, 4  ;;  %s2080_s30 = sld [smem:[#allocation16_spill]]  ;;  %s1910_s9 = int_to_ptr.vmem [resolvable:$true] %s803_s9 }
  0x80   : > { %1003 = vmatpush3.bf16.xpose.msra.mxu0 %v1184_v1  ;;  %1042 = vmatpush3.bf16.xpose.msra.mxu1 %v1184_v1  ;;  %v1193_v5 = vld [vmem:[%s1722_s10 + $0x20] sm:$0xff]   ;;  %v1190_v9 = vld [vmem:[%s1729_s8 + $0x30] sm:$0xff]   ;;  %v1191_v10 = vld [vmem:[%s1729_s8 + $0x38] sm:$0xff]   ;;  %v1795_v18 = vshrl.u32 %v554_v17, 7  ;;  %v606_v22 = vand.u32 127, %v554_v17  ;;  %v607_v32 = vstv %s979_s3  ;;  %s785_s27 = scalar_lea.sflag [#allocation4], %s248_s4 }
  0x81   : > { %1004 = vmatprep.subr.bf16.mxu0 %v1185_v2  ;;  %1035 = vmatprep.subr.bf16.mxu1 %v1185_v2  ;;  %v1188_v7 = vld [vmem:[%s1729_s8 + $0x20] sm:$0xff]   ;;  %v1194_v11 = vld [vmem:[%s1722_s10 + $0x8] sm:$0xff]   ;;  %v1196_v13 = vld [vmem:[%s1722_s10 + $0x10] sm:$0xff]   ;;  %s1292_s15 = scalar_lea.vmem %s1910_s9, 16  ;;  %p2081_p12 = scmp.ne.s32.totalorder %s2066_s7, 0 }
  0x82   : > { %1018 = vmatprep.mubr.bf16.mxu0 %v1192_v4  ;;  %1026 = vmatprep.mubr.bf16.mxu1 %v1193_v5  ;;  %v1195_v12 = vld [vmem:[%s1722_s10 + $0x28] sm:$0xff]   ;;  %v1198_v14 = vld [vmem:[%s1722_s10 + $0x30] sm:$0xff]   ;;  %v1197_v15 = vld [vmem:[%s1722_s10 + $0x18] sm:$0xff]   ;;  %v565_v21 = vadd.s32 80, %v1795_v18  ;;  %v557_v23 = vadd.s32 16, %v1795_v18  ;;  %v1804_v43 = vadd.s32 %v607_v32, %v606_v22  ;;  %v558_v47 = vadd.s32 24, %v1795_v18  ;;  %p1293_p4 = scmp.ne.s32.totalorder %s1910_s9, %s1292_s15 }
  0x83   : > { %v1199_v16 = vld [vmem:[%s1722_s10 + $0x38] sm:$0xff]   ;;  %v563_v49 = vadd.s32 64, %v1795_v18  ;;  %v566_v50 = vadd.s32 88, %v1795_v18  ;;  %v556_v51 = vadd.s32 8, %v1795_v18  ;;  %v572_v56 = vadd.s32 %v1801_v28, %v1795_v18  ;;  %s980_s10 = sshll.u32 %s1430_s22, 1 }
  0x84   : > { %v582_v39 = vadd.s32 %v1801_v28, %v565_v21  ;;  %v574_v44 = vadd.s32 %v1801_v28, %v557_v23  ;;  %vm609_vm2 = vcmp.lt.s32.totalorder %v1804_v43, 176  ;;  %v575_v63 = vadd.s32 %v1801_v28, %v558_v47  ;;  %s799_s18 = sadd.s32 %s1426_s21, %s980_s10  ;;  %p1294_p3 = pnand %p1293_p4, %p2081_p12 }
  0x85   : > { %v573_v4 = vadd.s32 %v1801_v28, %v556_v51  ;;  %vm588_vm7 = vcmp.lt.s32.totalorder %v572_v56, 200  ;;  %s981_s23 = sshll.u32 %s799_s18, 4  ;;  %s1449_s21 = smov [#allocation7]  }
  0x86   : > { %vm598_vm1 = vcmp.lt.s32.totalorder %v582_v39, 200  ;;  %vm590_vm3 = vcmp.lt.s32.totalorder %v574_v44, 200  ;;  %vm591_vm6 = vcmp.lt.s32.totalorder %v575_v63, 200  ;;  %vm644_vm10 = vmand %vm588_vm7, %vm609_vm2  ;;  %s1908_s24 = scalar_lea.hbm %s2080_s30, %s981_s23  ;;  %p1295_p2 = pneg %p1294_p3 }
  0x87   : > { %vm1823_vm4 = vmand %vm590_vm3, %vm609_vm2  ;;  %vm589_vm8 = vcmp.lt.s32.totalorder %v573_v4, 200  ;;  %v569_v4 = vadd.s32 112, %v1795_v18  ;;  %s1296_s22 = sshll.u32 %s1449_s21, 4  ;;  %s1297_s22 = int_to_ptr.vmem [resolvable:$false] %s1296_s22 }
  0x88   : > { %1005 = vmatpush3.bf16.xpose.msra.mxu0 %v1185_v2  ;;  %1043 = vmatpush3.bf16.xpose.msra.mxu1 %v1185_v2  ;;  %vm654_vm5 = vmand %vm598_vm1, %vm609_vm2  ;;  %s1298_s3 = scalar_lea.vmem %s1297_s22, 32  ;;  %p1299_p11 = scmp.lt.s32.totalorder %s1910_s9, %s1297_s22 }
  0x89   : > { %1006 = vmatprep.subr.bf16.mxu0 %v1186_v3  ;;  %1036 = vmatprep.subr.bf16.mxu1 %v1186_v3  ;;  %vm647_vm9 = vmand %vm591_vm6, %vm609_vm2  ;;  %p1300_p8 = scmp.lt.s32.totalorder %s1298_s3, %s1292_s15 }
  0x8a   : > { %vm645_vm13 = vmand %vm589_vm8, %vm609_vm2 }
  0x8b   : > { %p1301_p0 = por %p1300_p8, %p1299_p11 }
  0x8d   : > { %p1302_p1 = pnand %p1301_p0, %p1295_p2 }
  0x90   : > { %1007 = vmatpush3.bf16.xpose.msra.mxu0 %v1186_v3  ;;  %1044 = vmatpush3.bf16.xpose.msra.mxu1 %v1186_v3 }
  0x91   : > { %1008 = vmatprep.subr.bf16.mxu0 %v1187_v6  ;;  %1037 = vmatprep.subr.bf16.mxu1 %v1187_v6 }
  0x98   : > { %1009 = vmatpush3.bf16.xpose.msra.mxu0 %v1187_v6  ;;  %1045 = vmatpush3.bf16.xpose.msra.mxu1 %v1187_v6 }
  0x99   : > { %1010 = vmatprep.subr.bf16.mxu0 %v1188_v7  ;;  %1038 = vmatprep.subr.bf16.mxu1 %v1188_v7 }
  0xa0   : > { %1011 = vmatpush3.bf16.xpose.msra.mxu0 %v1188_v7  ;;  %1046 = vmatpush3.bf16.xpose.msra.mxu1 %v1188_v7  ;;  %v559_v7 = vadd.s32 32, %v1795_v18 }
  0xa1   : > { %1012 = vmatprep.subr.bf16.mxu0 %v1189_v8  ;;  %1039 = vmatprep.subr.bf16.mxu1 %v1189_v8 }
  0xa2   : > { %v576_v21 = vadd.s32 %v1801_v28, %v559_v7 }
  0xa4   : > { %vm592_vm14 = vcmp.lt.s32.totalorder %v576_v21, 200 }
  0xa8   : > { %1013 = vmatpush3.bf16.xpose.msra.mxu0 %v1189_v8  ;;  %1047 = vmatpush3.bf16.xpose.msra.mxu1 %v1189_v8 }
  0xa9   : > { %1014 = vmatprep.subr.bf16.mxu0 %v1190_v9  ;;  %1040 = vmatprep.subr.bf16.mxu1 %v1190_v9 }
  0xb0   : > { %1015 = vmatpush3.bf16.xpose.msra.mxu0 %v1190_v9  ;;  %1048 = vmatpush3.bf16.xpose.msra.mxu1 %v1190_v9  ;;  %v586_v9 = vadd.s32 %v1801_v28, %v569_v4 }
  0xb1   : > { %1016 = vmatprep.subr.bf16.mxu0 %v1191_v10  ;;  %1041 = vmatprep.subr.bf16.mxu1 %v1191_v10 }
  0xb8   : > { %1017 = vmatpush3.bf16.xpose.msra.mxu0 %v1191_v10  ;;  %1049 = vmatpush3.bf16.xpose.msra.mxu1 %v1191_v10  ;;  %v580_v10 = vadd.s32 %v1801_v28, %v563_v49 }
  0xba   : > { %vm596_vm12 = vcmp.lt.s32.totalorder %v580_v10, 200 }
  0xbb   : > { %vm652_vm1 = vmand %vm596_vm12, %vm609_vm2 }
  0xbf   : > { %1019 = vmatmul.mubr.bf16.vlgmr.msra.gmra.mrb[0].mxu0 %v1194_v11  ;;  %1027 = vmatmul.mubr.bf16.vlgmr.msra.gmra.mrb[0].mxu1 %v1195_v12  ;;  %v583_v11 = vadd.s32 %v1801_v28, %v566_v50  ;;  %v564_v12 = vadd.s32 72, %v1795_v18 }
  0xc0   : > { %1022 = vmatprep.mubr.bf16.mxu0 %v1196_v13  ;;  %1030 = vmatprep.mubr.bf16.mxu1 %v1198_v14  ;;  %v560_v14 = vadd.s32 40, %v1795_v18 }
  0xc1   : > { %v581_v23 = vadd.s32 %v1801_v28, %v564_v12  ;;  %vm599_vm11 = vcmp.lt.s32.totalorder %v583_v11, 200 }
  0xc2   : > { %vm655_vm15 = vmand %vm599_vm11, %vm609_vm2 }
  0xc3   : > { %vm597_vm0 = vcmp.lt.s32.totalorder %v581_v23, 200 }
  0xc7   : > { %1023 = vmatmul.mubr.bf16.gmra.mrb[4].mxu0 %v1197_v15  ;;  %1031 = vmatmul.mubr.bf16.gmra.mrb[4].mxu1 %v1199_v16 }
 0x192   : > { %v1020_v19 = vpop.f32.mrb[0].mxu0  ;;  %v1028_v20 = vpop.f32.mrb[0].mxu1 }
 0x193   : > { %v964_v24 = vadd.f32 -14.285714, %v1020_v19  ;;  %v972_v25 = vadd.f32 -14.285714, %v1028_v20  ;;  %v442_v26 = vpop.f32.mrb[1].mxu0  ;;  %v474_v27 = vpop.f32.mrb[1].mxu1 }
 0x194   : > { %v962_v29 = vadd.f32 -14.285714, %v442_v26  ;;  %v1021_v30 = vpop.f32.mrb[2].mxu0  ;;  %v1029_v31 = vpop.f32.mrb[2].mxu1  ;;  %v970_v37 = vadd.f32 -14.285714, %v474_v27  ;;  %v577_v26 = vadd.s32 %v1801_v28, %v560_v14 }
 0x195   : > { %v525_v33 = vmul.f32 1.442695, %v964_v24  ;;  %v541_v34 = vmul.f32 1.442695, %v972_v25  ;;  %v965_v35 = vadd.f32 -14.285714, %v1021_v30 }
 0x196   : > { %v521_v36 = vmul.f32 1.442695, %v962_v29  ;;  %v973_v38 = vadd.f32 -14.285714, %v1029_v31  ;;  %v445_v41 = vpop.f32.mrb[3].mxu0  ;;  %v477_v42 = vpop.f32.mrb[3].mxu1 }
 0x197   : > { %1200 = vpow2.f32 %v525_v33  ;;  %v527_v40 = vmul.f32 1.442695, %v965_v35  ;;  %v963_v46 = vadd.f32 -14.285714, %v445_v41  ;;  %v971_v48 = vadd.f32 -14.285714, %v477_v42 }
 0x198   : > { %1202 = vpow2.f32 %v541_v34  ;;  %v543_v45 = vmul.f32 1.442695, %v973_v38  ;;  %v537_v52 = vmul.f32 1.442695, %v970_v37  ;;  %v561_v20 = vadd.s32 48, %v1795_v18 }
 0x199   : > { %1204 = vpow2.f32 %v521_v36  ;;  %v523_v53 = vmul.f32 1.442695, %v963_v46  ;;  %v539_v0 = vmul.f32 1.442695, %v971_v48  ;;  %v562_v25 = vadd.s32 56, %v1795_v18 }
 0x19a   : > { %v1024_v54 = vpop.f32.mrb[4].mxu0  ;;  %v1811_v55 = vpop.f32.mrb[4].mxu1  ;;  %1206 = vpow2.f32 %v527_v40  ;;  %v578_v33 = vadd.s32 %v1801_v28, %v561_v20  ;;  %vm593_vm3 = vcmp.lt.s32.totalorder %v577_v26, 200 }
 0x19b   : > { %v968_v57 = vadd.f32 -14.285714, %v1024_v54  ;;  %v458_v58 = vpop.f32.mrb[5].mxu0  ;;  %v490_v59 = vpop.f32.mrb[5].mxu1  ;;  %1208 = vpow2.f32 %v543_v45  ;;  %v579_v38 = vadd.s32 %v1801_v28, %v562_v25  ;;  %v976_v44 = vadd.f32 -14.285714, %v1811_v55  ;;  %vm649_vm7 = vmand %vm593_vm3, %vm609_vm2 }
 0x19c   : > { %v966_v60 = vadd.f32 -14.285714, %v458_v58  ;;  %v1025_v61 = vpop.f32.mrb[6].mxu0  ;;  %v1816_v62 = vpop.f32.mrb[6].mxu1  ;;  %1210 = vpow2.f32 %v523_v53  ;;  %v974_v31 = vadd.f32 -14.285714, %v490_v59 }
 0x19d   : > { %v969_v1 = vadd.f32 -14.285714, %v1025_v61  ;;  %v461_v2 = vpop.f32.mrb[7].mxu0  ;;  %v493_v3 = vpop.f32.mrb[7].mxu1  ;;  %1212 = vpow2.f32 %v537_v52  ;;  %v533_v8 = vmul.f32 1.442695, %v968_v57 }
 0x19e   : > { %v529_v5 = vmul.f32 1.442695, %v966_v60  ;;  %v967_v6 = vadd.f32 -14.285714, %v461_v2  ;;  %v975_v29 = vadd.f32 -14.285714, %v493_v3 }
 0x19f   : > { %v535_v16 = vmul.f32 1.442695, %v969_v1  ;;  %v977_v39 = vadd.f32 -14.285714, %v1816_v62  ;;  %v545_v45 = vmul.f32 1.442695, %v974_v31 }
 0x1a0   : > { %1214 = vpow2.f32 %v529_v5  ;;  %v531_v13 = vmul.f32 1.442695, %v967_v6  ;;  %v547_v40 = vmul.f32 1.442695, %v975_v29  ;;  %vm594_vm6 = vcmp.lt.s32.totalorder %v578_v33, 200 }
 0x1a1   : > { %v1201_v15 = vpop.eup %1200  ;;  %1216 = vpow2.f32 %v539_v0  ;;  %vm595_vm8 = vcmp.lt.s32.totalorder %v579_v38, 200  ;;  %v568_v53 = vadd.s32 104, %v1795_v18  ;;  %v551_v55 = vmul.f32 1.442695, %v977_v39 }
 0x1a2   : > { %v1203_v17 = vpop.eup %1202  ;;  %1218 = vpow2.f32 %v531_v13  ;;  %v662_v19 = vsel %vm1823_vm4, %v1201_v15, 0.0  ;;  %vm648_vm4 = vmand %vm592_vm14, %vm609_vm2  ;;  %v567_v57 = vadd.s32 96, %v1795_v18  ;;  %v549_v58 = vmul.f32 1.442695, %v976_v44 }
 0x1a3   : > { %1220 = vpow2.f32 %v533_v8  ;;  %v1838_v22 = vsel %vm654_vm5, %v1203_v17, 0.0  ;;  %696 = vadd.xlane.f32.xlu1 %v662_v19  ;;  %v1205_v24 = vpop.eup %1204  ;;  %vm1869_vm5 = vmand %vm597_vm0, %vm609_vm2  ;;  %v585_v0 = vadd.s32 %v1801_v28, %v568_v53  ;;  %v570_v1 = vadd.s32 120, %v1795_v18 }
 0x1a4   : > { %712 = vadd.xlane.f32.xlu0 %v1838_v22  ;;  %v1207_v27 = vpop.eup %1206  ;;  %1222 = vpow2.f32 %v535_v16  ;;  %v660_v35 = vsel %vm644_vm10, %v1205_v24, 0.0  ;;  %vm651_vm10 = vmand %vm595_vm8, %vm609_vm2  ;;  %v584_v3 = vadd.s32 %v1801_v28, %v567_v57  ;;  %vm602_vm0 = vcmp.lt.s32.totalorder %v586_v9, 200 }
 0x1a5   : > { %v1209_v30 = vpop.eup %1208  ;;  %v663_v32 = vsel %vm647_vm9, %v1207_v27, 0.0  ;;  %1224 = vpow2.f32 %v547_v40  ;;  %vm650_vm9 = vmand %vm594_vm6, %vm609_vm2  ;;  %vm601_vm11 = vcmp.lt.s32.totalorder %v585_v0, 200  ;;  %v587_v7 = vadd.s32 %v1801_v28, %v570_v1 }
 0x1a6   : > { %v1211_v34 = vpop.eup %1210  ;;  %v1864_v46 = vsel %vm655_vm15, %v1209_v30, 0.0  ;;  %1226 = vpow2.f32 %v545_v45  ;;  %vm600_vm12 = vcmp.lt.s32.totalorder %v584_v3, 200  ;;  %vm658_vm3 = vmand %vm602_vm0, %vm609_vm2 }
 0x1a7   : > { %698 = vadd.xlane.f32.xlu1 %v663_v32  ;;  %v1213_v36 = vpop.eup %1212  ;;  %v661_v37 = vsel %vm645_vm13, %v1211_v34, 0.0  ;;  %1228 = vpow2.f32 %v551_v55  ;;  %vm657_vm13 = vmand %vm601_vm11, %vm609_vm2  ;;  %vm603_vm15 = vcmp.lt.s32.totalorder %v587_v7, 200 }
 0x1a8   : > { %692 = vadd.xlane.f32.xlu0 %v660_v35  ;;  %v757_v41 = vadd.f32 %v661_v37, %v660_v35  ;;  %v668_v49 = vsel %vm652_vm1, %v1213_v36, 0.0  ;;  %1230 = vpow2.f32 %v549_v58  ;;  %vm656_vm14 = vmand %vm600_vm12, %vm609_vm2 }
 0x1a9   : > { %vm659_vm1 = vmand %vm603_vm15, %vm609_vm2 }
 0x1aa   : > { %v1215_v42 = vpop.eup %1214  ;;  %v758_v50 = vadd.f32 %v757_v41, %v662_v19 }
 0x1ab   : > { %v1217_v48 = vpop.eup %1216  ;;  %714 = vadd.xlane.f32.xlu1 %v1864_v46  ;;  %v664_v52 = vsel %vm648_vm4, %v1215_v42, 0.0 }
 0x1ac   : > { %v1219_v51 = vpop.eup %1218  ;;  %708 = vadd.xlane.f32.xlu0 %v668_v49  ;;  %v759_v56 = vadd.f32 %v758_v50, %v663_v32  ;;  %v669_v59 = vsel %vm1869_vm5, %v1217_v48, 0.0 }
 0x1ad   : > { %v1221_v54 = vpop.eup %1220  ;;  %v665_v60 = vsel %vm649_vm7, %v1219_v51, 0.0 }
 0x1ae   : > { %v1223_v61 = vpop.eup %1222  ;;  %v760_v62 = vadd.f32 %v759_v56, %v664_v52  ;;  %v666_v63 = vsel %vm650_vm9, %v1221_v54, 0.0 }
 0x1af   : > { %710 = vadd.xlane.f32.xlu1 %v669_v59  ;;  %v667_v5 = vsel %vm651_vm10, %v1223_v61, 0.0  ;;  %v1225_v10 = vpop.eup %1224 }
 0x1b0   : > { %694 = vadd.xlane.f32.xlu0 %v661_v37  ;;  %v761_v2 = vadd.f32 %v760_v62, %v665_v60  ;;  %v1227_v12 = vpop.eup %1226  ;;  %v673_v13 = vsel %vm657_vm13, %v1225_v10, 0.0 }
 0x1b1   : > { %v1229_v14 = vpop.eup %1228  ;;  %v672_v15 = vsel %vm656_vm14, %v1227_v12, 0.0 }
 0x1b2   : > { %v762_v6 = vadd.f32 %v761_v2, %v666_v63  ;;  %v1231_v28 = vpop.eup %1230  ;;  %v675_v19 = vsel %vm659_vm1, %v1229_v14, 0.0 }
 0x1b3   : > { %706 = vadd.xlane.f32.xlu1 %v667_v5  ;;  %v674_v21 = vsel %vm658_vm3, %v1231_v28, 0.0 }
 0x1b4   : > { %704 = vadd.xlane.f32.xlu0 %v666_v63  ;;  %v763_v8 = vadd.f32 %v762_v6, %v667_v5 }
 0x1b6   : > { %v764_v11 = vadd.f32 %v763_v8, %v668_v49 }
 0x1b7   : > { %702 = vadd.xlane.f32.xlu1 %v665_v60 }
 0x1b8   : > { %700 = vadd.xlane.f32.xlu0 %v664_v52  ;;  %v765_v18 = vadd.f32 %v764_v11, %v669_v59 }
 0x1ba   : > { %v766_v16 = vadd.f32 %v765_v18, %v1838_v22 }
 0x1bb   : > { %718 = vadd.xlane.f32.xlu1 %v673_v13 }
 0x1bc   : > { %716 = vadd.xlane.f32.xlu0 %v672_v15  ;;  %v767_v17 = vadd.f32 %v766_v16, %v1864_v46 }
 0x1be   : > { %v768_v20 = vadd.f32 %v767_v17, %v672_v15 }
 0x1bf   : > { %722 = vadd.xlane.f32.xlu1 %v675_v19 }
 0x1c0   : > { %720 = vadd.xlane.f32.xlu0 %v674_v21  ;;  %v769_v22 = vadd.f32 %v768_v20, %v673_v13 }
 0x1c2   : > { %v770_v23 = vadd.f32 %v769_v22, %v674_v21 }
 0x1c4   : > { %v771_v24 = vadd.f32 %v770_v23, %v675_v19 }
 0x1c6   : > { %v772_v25 = vrot.slane %v771_v24, 4 }
 0x1c8   : > { %v773_v26 = vadd.f32 %v772_v25, %v771_v24 }
 0x1ca   : > { %v774_v43 = vrot.slane %v773_v26, 2 }
 0x1cc   : > { %v775_v27 = vadd.f32 %v774_v43, %v773_v26 }
 0x1ce   : > { %v776_v29 = vrot.slane %v775_v27, 1 }
 0x1d0   : > { %v777_v30 = vadd.f32 %v776_v29, %v775_v27 }
 0x1d2   : > { %778 = vst [vmem:[%s1744_s26] sm:$0x1] %v777_v30 }
 0x1d3   : > { %1305 = shalt.err (!%p1302_p1)
}
 0x1d4   : > { %s1306_s4 = scalar_lea.hbm %s1908_s24, 16  ;;  %s1310_s18 = scalar_lea.hbm %s2080_s30, 64 }
 0x1d5   : > { %p1307_p5 = scmp.ne.s32.totalorder %s1908_s24, %s1306_s4  ;;  %p1311_p9 = scmp.lt.u32.totalorder %s1908_s24, %s2080_s30 }
 0x1d6   : > { %p1312_p13 = scmp.lt.u32.totalorder %s1310_s18, %s1306_s4  ;;  %p1314_p4 = scmp.lt.u32.totalorder %s1306_s4, %s1908_s24 }
 0x1d7   : > { %p1308_p7 = pnand %p1307_p5, %p2081_p12 }
 0x1d8   : > { %p1313_p6 = por %p1312_p13, %p1311_p9 }
 0x1d9   : > { %p1309_p10 = pneg %p1308_p7 }
 0x1da   : > { %p1315_p3 = por %p1314_p4, %p1313_p6 }
 0x1dc   : > { %p1316_p2 = pnand %p1315_p3, %p1309_p10 }
 0x1de   : > { %1319 = shalt.err (!%p1316_p2)
}
 0x1df   : > { %1054 = dma.vmem_to_hbm [thread:$0]  (%p2081_p12), %s1910_s9, 16, %s1908_s24, %s785_s27   ;;  %v678_v31 = vld [vmem:[%s1740_s29 + $0x10] sm:$0xff]  ;;  %vm740_vm2 = vcmask 7168   ;;  %v679_v37 = vld [vmem:[%s1740_s29 + $0x18] sm:$0xff]  ;;  %v676_v38 = vld [vmem:[%s1740_s29] sm:$0xff] }
 0x1e0   : > { %v686_v32 = vld [vmem:[%s1740_s29 + $0x50] sm:$0xff]  ;;  %v687_v44 = vld [vmem:[%s1740_s29 + $0x58] sm:$0xff]  ;;  %v684_v45 = vld [vmem:[%s1740_s29 + $0x40] sm:$0xff] }
 0x1e1   : > { %v685_v50 = vld [vmem:[%s1740_s29 + $0x48] sm:$0xff]  ;;  %v683_v56 = vld [vmem:[%s1740_s29 + $0x38] sm:$0xff]  ;;  %v682_v57 = vld [vmem:[%s1740_s29 + $0x30] sm:$0xff] }
 0x1e2   : > { %v677_v51 = vld [vmem:[%s1740_s29 + $0x8] sm:$0xff]  ;;  %v680_v63 = vld [vmem:[%s1740_s29 + $0x20] sm:$0xff]  ;;  %v691_v10 = vld [vmem:[%s1740_s29 + $0x78] sm:$0xff] }
 0x1e3   : > { %v681_v62 = vld [vmem:[%s1740_s29 + $0x28] sm:$0xff]  ;;  %v688_v5 = vld [vmem:[%s1740_s29 + $0x60] sm:$0xff]  ;;  %v690_v11 = vld [vmem:[%s1740_s29 + $0x70] sm:$0xff] }
 0x1e4   : > { %v689_v4 = vld [vmem:[%s1740_s29 + $0x68] sm:$0xff] }
 0x230   : > { %v697_v33 = vpop.xlane.xlu1 %696 }
 0x231   : > { %v713_v34 = vpop.xlane.xlu0 %712  ;;  %v726_v35 = vadd.f32 %v697_v33, %v678_v31 }
 0x232   : > { %v734_v36 = vadd.f32 %v713_v34, %v686_v32 }
 0x233   : > { %743 = vst.msk [vmem:[%s1740_s29 + $0x10] sm:$0xff] %vm740_vm2, %v726_v35 }
 0x234   : > { %751 = vst.msk [vmem:[%s1740_s29 + $0x50] sm:$0xff] %vm740_vm2, %v734_v36  ;;  %v699_v39 = vpop.xlane.xlu1 %698 }
 0x235   : > { %v693_v40 = vpop.xlane.xlu0 %692  ;;  %v727_v41 = vadd.f32 %v699_v39, %v679_v37 }
 0x236   : > { %v724_v42 = vadd.f32 %v693_v40, %v676_v38 }
 0x237   : > { %744 = vst.msk [vmem:[%s1740_s29 + $0x18] sm:$0xff] %vm740_vm2, %v727_v41 }
 0x238   : > { %741 = vst.msk [vmem:[%s1740_s29] sm:$0xff] %vm740_vm2, %v724_v42  ;;  %v715_v46 = vpop.xlane.xlu1 %714 }
 0x239   : > { %v709_v47 = vpop.xlane.xlu0 %708  ;;  %v735_v48 = vadd.f32 %v715_v46, %v687_v44 }
 0x23a   : > { %v732_v49 = vadd.f32 %v709_v47, %v684_v45 }
 0x23b   : > { %752 = vst.msk [vmem:[%s1740_s29 + $0x58] sm:$0xff] %vm740_vm2, %v735_v48 }
 0x23c   : > { %749 = vst.msk [vmem:[%s1740_s29 + $0x40] sm:$0xff] %vm740_vm2, %v732_v49  ;;  %v711_v52 = vpop.xlane.xlu1 %710 }
 0x23d   : > { %v733_v53 = vadd.f32 %v711_v52, %v685_v50  ;;  %v695_v54 = vpop.xlane.xlu0 %694 }
 0x23e   : > { %v725_v55 = vadd.f32 %v695_v54, %v677_v51 }
 0x23f   : > { %750 = vst.msk [vmem:[%s1740_s29 + $0x48] sm:$0xff] %vm740_vm2, %v733_v53 }
 0x240   : > { %742 = vst.msk [vmem:[%s1740_s29 + $0x8] sm:$0xff] %vm740_vm2, %v725_v55  ;;  %v707_v58 = vpop.xlane.xlu1 %706 }
 0x241   : > { %v705_v59 = vpop.xlane.xlu0 %704  ;;  %v731_v60 = vadd.f32 %v707_v58, %v683_v56 }
 0x242   : > { %v730_v61 = vadd.f32 %v705_v59, %v682_v57 }
 0x243   : > { %748 = vst.msk [vmem:[%s1740_s29 + $0x38] sm:$0xff] %vm740_vm2, %v731_v60 }
 0x244   : > { %747 = vst.msk [vmem:[%s1740_s29 + $0x30] sm:$0xff] %vm740_vm2, %v730_v61  ;;  %v703_v0 = vpop.xlane.xlu1 %702 }
 0x245   : > { %v701_v1 = vpop.xlane.xlu0 %700  ;;  %v729_v2 = vadd.f32 %v703_v0, %v681_v62 }
 0x246   : > { %v728_v3 = vadd.f32 %v701_v1, %v680_v63 }
 0x247   : > { %746 = vst.msk [vmem:[%s1740_s29 + $0x28] sm:$0xff] %vm740_vm2, %v729_v2 }
 0x248   : > { %745 = vst.msk [vmem:[%s1740_s29 + $0x20] sm:$0xff] %vm740_vm2, %v728_v3  ;;  %v719_v6 = vpop.xlane.xlu1 %718 }
 0x249   : > { %v717_v7 = vpop.xlane.xlu0 %716  ;;  %v737_v8 = vadd.f32 %v719_v6, %v689_v4 }
 0x24a   : > { %v736_v9 = vadd.f32 %v717_v7, %v688_v5 }
 0x24b   : > { %754 = vst.msk [vmem:[%s1740_s29 + $0x68] sm:$0xff] %vm740_vm2, %v737_v8 }
 0x24c   : > { %753 = vst.msk [vmem:[%s1740_s29 + $0x60] sm:$0xff] %vm740_vm2, %v736_v9  ;;  %v723_v12 = vpop.xlane.xlu1 %722 }
 0x24d   : > { %v721_v18 = vpop.xlane.xlu0 %720  ;;  %v739_v13 = vadd.f32 %v723_v12, %v691_v10 }
 0x24e   : > { %v738_v14 = vadd.f32 %v721_v18, %v690_v11 }
 0x24f   : > { %756 = vst.msk [vmem:[%s1740_s29 + $0x78] sm:$0xff] %vm740_vm2, %v739_v13 }
 0x250   : > { %755 = vst.msk [vmem:[%s1740_s29 + $0x70] sm:$0xff] %vm740_vm2, %v738_v14 }
 0x251 PF: > { %p1068_p12 = scmp.ge.s32.totalorder %s1442_s25, 2  ;;  %s823_s7 = sand.u32 1, %s1390_s12  }
 0x252   : > { %p2082_p11 = scmp.ne.s32.totalorder %s2069_s28, 0  ;;  %s824_s9 = scalar_lea.sflag [#allocation4], %s823_s7 }
 0x254   : > { %p1064_p8 = pnand %p1068_p12, %p2082_p11 }
 0x256   : > { %1385 = dma.done.wait (!%p1064_p8), %s824_s9, 16  }
 0x257   : > { %1387 = vsyncadd (!%p1064_p8), %s824_s9, 4294967280  ;;  %s23_s25 = sadd.s32 1, %s1442_s25   ;;  %s2084_s21 = sld [smem:[#allocation11_spill]] }
 0x258   : > { %p1989_p0 = scmp.ge.s32.totalorder %s23_s25, 6   ;;  %s2085_s22 = sld [smem:[#allocation12_spill]] }
 0x259   : > { %s2086_s23 = sld [smem:[#allocation13_spill]]  ;;  %s2087_s24 = sld [smem:[#allocation14_spill]] }
 0x25a   : > { %s2088_s12 = smov %s1394_s13  ;;  %s2089_s13 = smov %s1398_s14 }
 0x25b   : > { %s2090_s14 = smov %s1662_s5  ;;  %s2091_s15 = smov %s1406_s16 }
 0x25c   : > { %s2092_s16 = smov %s1410_s17  ;;  %s2093_s17 = smov %s1644_s6 }
 0x25d   : > { %s2094_s18 = smov %s1418_s19  ;;  %s2095_s19 = smov %s1422_s20 }
 0x25e   : > { %s2096_s20 = smov %s1659_s0  ;;  %22 = sbr.rel (!%p1989_p0) target bundleno = 15 (0xf), region = 102 }
 0x265   :  { %828 = vsyncpa [#allocation3], 1 }
 0x266   :  { %830 = vsyncpa [#allocation3 + $0x1], 1 }
 0x267   :  { %831 = vsyncpa [#allocation6], 1 }
 0x268   :  { %833 = vsyncpa [#allocation6 + $0x1], 1 }
 0x269   :  { %834 = vsyncpa [#allocation4], 1 }
 0x26a   :  { %836 = vsyncpa [#allocation4 + $0x1], 1 }

</bundles_post_ra>
